<compile_context>
chip_gen: v7x
topology: tpu7x:2x2x1
jax: 0.10.0
libtpu: 0.0.40
codegen_flags: <defaults>
</compile_context>

<pallas_src>
import functools

import jax
import jax.numpy as jnp
from jax.experimental import pallas as pl
from jax.experimental.pallas import tpu as pltpu


def _round_up(x, m):
    return -(-x // m) * m


def _fold_width_max(acc, out_width, o_ch):
    """Max over width groups laid out along lanes as [w=0 | w=1 | ...].

    acc: (TN, out_width * o_ch) f32  ->  (TN, o_ch) f32.
    When 2*o_ch is a multiple of 128 the fold first reduces full-vreg pairs
    (aligned lane-tile maxima, pure VPU) and does a single sub-vreg combine at
    the end; otherwise it falls back to a simple per-group fold.
    """
    if out_width == 1:
        return acc[:, :o_ch]
    if (2 * o_ch) % 128 == 0:
        pairs = out_width // 2
        m = acc[:, : 2 * o_ch]
        for g in range(1, pairs):
            m = jnp.maximum(m, acc[:, g * 2 * o_ch:(g + 1) * 2 * o_ch])
        pooled = jnp.maximum(m[:, :o_ch], m[:, o_ch:])
        if out_width % 2:
            pooled = jnp.maximum(pooled, acc[:, (out_width - 1) * o_ch:])
        return pooled
    pooled = acc[:, :o_ch]
    for wpos in range(1, out_width):
        pooled = jnp.maximum(pooled, acc[:, wpos * o_ch:(wpos + 1) * o_ch])
    return pooled


def _char_conv_kernel(x_ref, w_ref, b_ref, o_ref, *, out_width, o_ch, mxu_dtype):
    """One N-tile: single block-Toeplitz matmul -> width-max -> +bias -> tanh.

    x_ref: (TN, C*W)            f32   raw input rows, channel-major
    w_ref: (C*W, out_width*O)   mxu_dtype   block-Toeplitz conv weight
    b_ref: (1, O)               f32
    o_ref: (TN, O_pad)          f32   O padded up to a 128-lane multiple
    """
    # VMEM-side cast to the MXU operand dtype (hidden under the DMA/MXU work).
    x = x_ref[...].astype(mxu_dtype)
    # One MXU matmul, f32 accumulation; columns grouped per output width pos.
    acc = jnp.dot(x, w_ref[...], preferred_element_type=jnp.float32)
    # Width max BEFORE bias + tanh (both monotone per channel => identical to
    # the PyTorch tanh -> max_pool2d order).
    pooled = _fold_width_max(acc, out_width, o_ch)            # (TN, O) f32
    act = jnp.tanh(pooled + b_ref[...])                       # (TN, O) f32
    pad_lanes = o_ref.shape[-1] - o_ch
    if pad_lanes:
        # Pad to a full 128-lane store (unmasked vst); wrapper slices it off.
        act = jnp.concatenate(
            [act, jnp.zeros((act.shape[0], pad_lanes), act.dtype)], axis=-1)
    o_ref[...] = act.astype(o_ref.dtype)


def _toeplitz_weight(weight, out_width, mxu_dtype):
    """(O, C, 1, K) conv weight -> (C*W_in, out_width*O) block-Toeplitz matrix.

    T[c*W + w_in, w_out*O + o] = weight[o, c, 0, w_in - w_out] when
    0 <= w_in - w_out < K, else 0.  x_flat @ T reproduces the VALID conv.
    """
    o, c, _, kw = weight.shape
    w_in = out_width + kw - 1
    wt = jnp.transpose(weight[:, :, 0, :], (1, 2, 0)).astype(jnp.float32)   # (C,K,O)
    taps = jnp.stack([jnp.eye(w_in, out_width, k=-j, dtype=jnp.float32)
                      for j in range(kw)])                                   # (K,W,ow)
    t4 = jnp.einsum("cko,kiw->ciwo", wt, taps)        # (C, W_in, out_width, O)
    return t4.reshape(c * w_in, out_width * o).astype(mxu_dtype)


def _vmem_estimate(tile_n, cw, ow_o, o_pad, mxu_bytes):
    return (2 * tile_n * cw * 4            # double-buffered f32 x tiles
            + tile_n * cw * mxu_bytes      # in-kernel MXU-dtype copy of x
            + 2 * cw * ow_o * mxu_bytes    # Toeplitz weight (constant block)
            + tile_n * ow_o * 4            # f32 matmul result (pre width-max)
            + 2 * tile_n * o_pad * 4)      # double-buffered f32 out tiles


def char_conv_layer(x_nchw, weight, bias, *, tile_n=None, mxu_dtype=jnp.bfloat16):
    """Pallas implementation of CharConvLayer.forward.

    x_nchw: (N, C, 1, W) float32   (N = batch * max_seq_length)
    weight: (O, C, 1, K) float32   (PyTorch Conv2d weight)
    bias:   (O,)         float32
    returns (N, O) float32
    """
    n, c, h, w = x_nchw.shape
    assert h == 1, "CharConvLayer expects height == 1"
    o, c_w, kh, kw = weight.shape
    assert c_w == c and kh == 1
    out_width = w - kw + 1
    assert out_width >= 1

    cw = c * w
    ow_o = out_width * o
    o_pad = _round_up(o, 128)
    mxu_bytes = jnp.dtype(mxu_dtype).itemsize

    # ---- tiny plain-JAX glue (no im2col, no extra passes over x) ----------
    x_flat = x_nchw.reshape(n, cw)                       # channel-major rows
    w_toep = _toeplitz_weight(weight, out_width, mxu_dtype)
    b_row = bias.reshape(1, o).astype(jnp.float32)

    # ---- tiling over N -----------------------------------------------------
    n_r8 = _round_up(n, 8)
    if tile_n is None:
        # Big tiles amortize the ~0.35us per-grid-step overhead; cap so that
        # production-sized N keeps >= 4 grid steps (>= 2 per v7x TensorCore).
        tile_n = min(1024, _round_up(-(-n // 4), 8))
    tile_n = _round_up(min(tile_n, n_r8), 8)
    # Re-budget against the smallest scoped VMEM (32 MiB default, 64 MiB
    # physical on v7x): shrink the tile until the working set has headroom.
    while tile_n > 8 and _vmem_estimate(tile_n, cw, ow_o, o_pad, mxu_bytes) > (24 << 20):
        tile_n = _round_up(tile_n // 2, 8)
    n_pad = _round_up(n, tile_n)
    if n_pad != n:
        # Zero-padded rows only produce tanh(bias) in rows that the final [:n]
        # slice drops -- keep that slice if this wrapper is ever refactored.
        x_flat = jnp.pad(x_flat, ((0, n_pad - n), (0, 0)))

    kernel = functools.partial(_char_conv_kernel, out_width=out_width,
                               o_ch=o, mxu_dtype=mxu_dtype)
    out = pl.pallas_call(
        kernel,
        out_shape=jax.ShapeDtypeStruct((n_pad, o_pad), jnp.float32),
        grid_spec=pltpu.PrefetchScalarGridSpec(
            num_scalar_prefetch=0,
            grid=(n_pad // tile_n,),
            in_specs=[
                pl.BlockSpec((tile_n, cw), lambda i: (i, 0)),    # lane-dense x
                pl.BlockSpec((cw, ow_o), lambda i: (0, 0)),      # full Toeplitz W
                pl.BlockSpec((1, o), lambda i: (0, 0)),          # full bias
            ],
            out_specs=pl.BlockSpec((tile_n, o_pad), lambda i: (i, 0)),
        ),
        compiler_params=pltpu.CompilerParams(
            dimension_semantics=("parallel",),
            vmem_limit_bytes=32 * 1024 * 1024),
    )(x_flat, w_toep, b_row)
    return out[:n, :o]


def _reference(x_nchw, weight, bias):
    """Pure-JAX reference (conv + tanh + max-pool + squeeze), f32."""
    conv = jax.lax.conv_general_dilated(
        x_nchw, weight, window_strides=(1, 1), padding="VALID",
        dimension_numbers=("NCHW", "OIHW", "NCHW"))
    z = jnp.tanh(conv + bias[None, :, None, None])    # (N, O, 1, out_width)
    return jnp.max(z, axis=(2, 3))                    # (N, O)


if __name__ == "__main__":
    # Small shapes consistent with the module's forward contract:
    #   N = batch * max_seq_length, C = c_embedding_size, W = max_seq_word_length
    batch, max_seq_length = 2, 8
    n = batch * max_seq_length          # 16
    c_embedding_size = 16               # in_channels
    max_seq_word_length = 16            # in_width
    kernel_w = 3                        # kernel_size = (1, 3)
    kernel_feature_size = 64            # out_channels

    key = jax.random.PRNGKey(0)
    kx, kwt, kb = jax.random.split(key, 3)

    x = jax.random.normal(
        kx, (n, c_embedding_size, 1, max_seq_word_length), dtype=jnp.float32)
    # Deterministic parameter init (mimics uniform(-param_init, param_init)).
    param_init = 0.1
    weight = jax.random.uniform(
        kwt, (kernel_feature_size, c_embedding_size, 1, kernel_w),
        minval=-param_init, maxval=param_init, dtype=jnp.float32)
    bias = jax.random.uniform(
        kb, (kernel_feature_size,), minval=-param_init, maxval=param_init,
        dtype=jnp.float32)

    ref = _reference(x, weight, bias)

    fwd = jax.jit(char_conv_layer, static_argnames=("tile_n", "mxu_dtype"))

    # f32 MXU-operand path: tight numerical check against the f32 reference.
    out_f32 = jax.block_until_ready(fwd(x, weight, bias, mxu_dtype=jnp.float32))
    assert out_f32.shape == (n, kernel_feature_size)
    assert jnp.allclose(out_f32, ref, atol=1e-4, rtol=1e-4), \
        f"f32 max abs err {jnp.max(jnp.abs(out_f32 - ref))}"

    # Default bf16 MXU-operand path (f32 accumulate / f32 post-math): looser
    # check -- bf16 operands deviate ~1e-2 from the f32 PyTorch layer near
    # tanh saturation (documented semantic difference).
    out_bf16 = jax.block_until_ready(fwd(x, weight, bias))
    assert out_bf16.shape == (n, kernel_feature_size)
    assert jnp.allclose(out_bf16, ref, atol=3e-2, rtol=3e-2), \
        f"bf16 max abs err {jnp.max(jnp.abs(out_bf16 - ref))}"

    print("KERNEL_OK")
</pallas_src>

<mosaic_0001>
module attributes {stable_mosaic.version = 11 : i64} {
  func.func @_char_conv_kernel(%arg0: i32, %arg1: memref<8x256xf32, #tpu.memory_space<vmem>>, %arg2: memref<256x896xf32, #tpu.memory_space<vmem>>, %arg3: memref<1x64xf32, #tpu.memory_space<vmem>>, %arg4: memref<8x128xf32, #tpu.memory_space<vmem>>) attributes {dimension_semantics = [#tpu.dimension_semantics<parallel>], iteration_bounds = array<i64: 2>, scalar_prefetch = 0 : i64, scratch_operands = 0 : i64, tpu.core_type = #tpu.core_type<tc>, window_params = [{transform_indices = @transform_0, window_bounds = array<i64: 8, 256>}, {pipeline_mode = #tpu.pipeline_mode<synchronous>, transform_indices = @transform_1, window_bounds = array<i64: 256, 896>}, {pipeline_mode = #tpu.pipeline_mode<synchronous>, transform_indices = @transform_2, window_bounds = array<i64: 1, 64>}, {transform_indices = @transform_3, window_bounds = array<i64: 8, 128>}]} {
    %c0 = arith.constant 0 : index
    %c0_0 = arith.constant 0 : index
    %0 = vector.load %arg1[%c0, %c0_0] : memref<8x256xf32, #tpu.memory_space<vmem>>, vector<8x256xf32>
    %c0_1 = arith.constant 0 : index
    %c0_2 = arith.constant 0 : index
    %1 = vector.load %arg2[%c0_1, %c0_2] : memref<256x896xf32, #tpu.memory_space<vmem>>, vector<256x896xf32>
    %cst = arith.constant dense<0.000000e+00> : vector<8x896xf32>
    %2 = tpu.matmul %0, %1, %cst {dimension_numbers = #tpu.dot_dimension_numbers<[1], [0], [0], [1], [0, 0, 1, 1], [], []>} : vector<8x256xf32>, vector<256x896xf32>, vector<8x896xf32> -> vector<8x896xf32>
    %3 = vector.extract_strided_slice %2 {offsets = [0, 0], sizes = [8, 128], strides = [1, 1]} : vector<8x896xf32> to vector<8x128xf32>
    %4 = vector.extract_strided_slice %2 {offsets = [0, 128], sizes = [8, 128], strides = [1, 1]} : vector<8x896xf32> to vector<8x128xf32>
    %5 = arith.maximumf %3, %4 : vector<8x128xf32>
    %6 = vector.extract_strided_slice %2 {offsets = [0, 256], sizes = [8, 128], strides = [1, 1]} : vector<8x896xf32> to vector<8x128xf32>
    %7 = arith.maximumf %5, %6 : vector<8x128xf32>
    %8 = vector.extract_strided_slice %2 {offsets = [0, 384], sizes = [8, 128], strides = [1, 1]} : vector<8x896xf32> to vector<8x128xf32>
    %9 = arith.maximumf %7, %8 : vector<8x128xf32>
    %10 = vector.extract_strided_slice %2 {offsets = [0, 512], sizes = [8, 128], strides = [1, 1]} : vector<8x896xf32> to vector<8x128xf32>
    %11 = arith.maximumf %9, %10 : vector<8x128xf32>
    %12 = vector.extract_strided_slice %2 {offsets = [0, 640], sizes = [8, 128], strides = [1, 1]} : vector<8x896xf32> to vector<8x128xf32>
    %13 = arith.maximumf %11, %12 : vector<8x128xf32>
    %14 = vector.extract_strided_slice %2 {offsets = [0, 768], sizes = [8, 128], strides = [1, 1]} : vector<8x896xf32> to vector<8x128xf32>
    %15 = arith.maximumf %13, %14 : vector<8x128xf32>
    %16 = vector.extract_strided_slice %15 {offsets = [0, 0], sizes = [8, 64], strides = [1, 1]} : vector<8x128xf32> to vector<8x64xf32>
    %17 = vector.extract_strided_slice %15 {offsets = [0, 64], sizes = [8, 64], strides = [1, 1]} : vector<8x128xf32> to vector<8x64xf32>
    %18 = arith.maximumf %16, %17 : vector<8x64xf32>
    %c0_3 = arith.constant 0 : index
    %c0_4 = arith.constant 0 : index
    %19 = vector.load %arg3[%c0_3, %c0_4] : memref<1x64xf32, #tpu.memory_space<vmem>>, vector<1x64xf32>
    %20 = vector.broadcast %19 : vector<1x64xf32> to vector<8x64xf32>
    %21 = arith.addf %18, %20 : vector<8x64xf32>
    %22 = math.tanh %21 : vector<8x64xf32>
    %cst_5 = arith.constant 0.000000e+00 : f32
    %23 = vector.broadcast %cst_5 : f32 to vector<8x64xf32>
    %24 = tpu.concatenate %22, %23 in 1 : vector<8x64xf32>, vector<8x64xf32> -> vector<8x128xf32>
    %c0_6 = arith.constant 0 : index
    %c0_7 = arith.constant 0 : index
    %25 = vector.load %arg4[%c0_6, %c0_7] : memref<8x128xf32, #tpu.memory_space<vmem>>, vector<8x128xf32>
    tpu.vector_store %arg4[%c0_6, %c0_7], %24 {strides = array<i32>} : memref<8x128xf32, #tpu.memory_space<vmem>>, vector<8x128xf32>,
    return
  }
  func.func @transform_0(%arg0: i32) -> (i32, i32) {
    %c0_i32 = arith.constant 0 : i32
    %c0_i32_0 = arith.constant 0 : i32
    return %arg0, %c0_i32 : i32, i32
  }
  func.func @transform_1(%arg0: i32) -> (i32, i32) {
    %c0_i32 = arith.constant 0 : i32
    %c0_i32_0 = arith.constant 0 : i32
    %c0_i32_1 = arith.constant 0 : i32
    return %c0_i32, %c0_i32_0 : i32, i32
  }
  func.func @transform_2(%arg0: i32) -> (i32, i32) {
    %c0_i32 = arith.constant 0 : i32
    %c0_i32_0 = arith.constant 0 : i32
    %c0_i32_1 = arith.constant 0 : i32
    return %c0_i32, %c0_i32_0 : i32, i32
  }
  func.func @transform_3(%arg0: i32) -> (i32, i32) {
    %c0_i32 = arith.constant 0 : i32
    %c0_i32_0 = arith.constant 0 : i32
    return %arg0, %c0_i32 : i32, i32
  }
}

</mosaic_0001>

<bundles_post_ra>
// kernel: char_conv_layer.1
= control target key start
LH: loop header
LB: loop body
LE: loop exit
PB: predicated region body
PF: predicated region fallthrough
CT: control target
= control target key end

     0   :  { %8 = vsyncpa [#allocation3], 0  ;;  %s1970_s0 = inlined_call_operand.vmem [shape: f32[16,256], index: 0, kind: input, shape index: {}]   ;;  %s1971_s1 = inlined_call_operand.vmem [shape: f32[256,896], index: 1, kind: input, shape index: {}]   ;;  %s1972_s2 = inlined_call_operand.vmem [shape: f32[1,64], index: 2, kind: input, shape index: {}]   ;;  %s1973_s3 = inlined_call_operand.hbm [shape: f32[16,128], index: 3, kind: output, shape index: {}]  }
   0x1   :  { %10 = vsyncpa [#allocation3 + $0x1], 0  ;;  %s1174_s12 = smov 0   ;;  %s1176_s13 = smov 0  }
   0x2   :  { %s1178_s14 = smov 0   ;;  %s1180_s15 = smov 0  }
   0x3 LB: > { %s1195_s16 = sadd.s32 4294967295, %s1150_s15   ;;  %s774_s17 = sadd.s32 4294967294, %s1150_s15   ;;  %s1150_s15 = sphi %s1180_s15, %s1979_s15   ;;  %s1146_s14 = sphi %s1178_s14, %s1978_s14   ;;  %s1142_s13 = sphi %s1176_s13, %s1977_s13   ;;  %s1138_s12 = sphi %s1174_s12, %s1976_s12  }
   0x4   : > { %s1199_s18 = sadd.s32 1, %s1150_s15   ;;  %s91_s19 = sadd.s32 1, %s1146_s14 }
   0x5   : > { %s88_s20 = ssub.s32 %s1150_s15, %s1199_s18  ;;  %p101_p0 = scmp.ne.s32.totalorder %s1146_s14, %s1142_s13 }
   0x6   : > { %p89_p1 = scmp.eq.s32.totalorder %s88_s20, 0  ;;  %p102_p2 = scmp.eq.s32.totalorder %s1195_s16, 1 }
   0x7   : > { %p107_p3 = scmp.ne.s32.totalorder %s1142_s13, %s1138_s12  ;;  %p108_p4 = scmp.eq.s32.totalorder %s774_s17, 1 }
   0x8   : > { %s1210_s21 = scalar_select %p89_p1, %s1146_s14, %s91_s19  }
   0x9   : > { %p1212_p5 = por %p102_p2, %p101_p0  ;;  %p1216_p6 = por %p108_p4, %p107_p3 }
   0xa   : > { %p777_p7 = scmp.ge.s32.totalorder %s1150_s15, 1  ;;  %p140_p8 = scmp.lt.s32.totalorder %s1150_s15, 3 }
   0xc   : > { %p141_p9 = pnand %p777_p7, %p140_p8 }
   0xd   : > { %v172_v0 = vld [vmem:[%s1971_s1 + $0x8] sm:$0xff] (!%p141_p9)  ;;  %v179_v1 = vld [vmem:[%s1971_s1 + $0x40] sm:$0xff] (!%p141_p9)  ;;  %v178_v4 = vld [vmem:[%s1971_s1 + $0x38] sm:$0xff] (!%p141_p9)  ;;  %p164_p10 = scmp.lt.s32.totalorder (!%p141_p9), %s1195_s16, 1  ;;  %s161_s9 = sand.u32 (!%p141_p9), 1, %s1142_s13   ;;  %vm698_vm0 = vcmask (!%p141_p9), 523264  }
   0xe   : > { %144 = sbr.rel (%p141_p9) target bundleno = 507 (0x1fb), region = 32  ;;  %v171_v2 = vld [vmem:[%s1971_s1] sm:$0xff] (!%p141_p9)  ;;  %v822_v3 = vpack.c.bf16 (!%p141_p9), %v179_v1, %v172_v0  ;;  %v174_v5 = vld [vmem:[%s1971_s1 + $0x18] sm:$0xff] (!%p141_p9)  ;;  %v181_v6 = vld [vmem:[%s1971_s1 + $0x50] sm:$0xff] (!%p141_p9)  ;;  %s783_s10 = sshll.u32 (!%p141_p9), %s1195_s16, 7 }
   0xf   : > { %v824_v7 = vpack.c.bf16 (!%p141_p9), %v178_v4, %v171_v2  ;;  %v886_v8 = vpack.c.bf16 (!%p141_p9), %v181_v6, %v174_v5  ;;  %v186_v9 = vld [vmem:[%s1971_s1 + $0x78] sm:$0xff] (!%p141_p9)  ;;  %v193_v10 = vld [vmem:[%s1971_s1 + $0xb0] sm:$0xff] (!%p141_p9)  ;;  %v180_v13 = vld [vmem:[%s1971_s1 + $0x48] sm:$0xff] (!%p141_p9)  ;;  %s1928_s25 = scalar_lea.hbm (!%p141_p9), %s1973_s3, %s783_s10  ;;  %s702_s26 = scalar_lea.sflag (!%p141_p9), [#allocation3], %s161_s9 }
  0x10   : > { %v173_v11 = vld [vmem:[%s1971_s1 + $0x10] sm:$0xff] (!%p141_p9)  ;;  %823 = vmatprep.subr.bf16.mxu0 (!%p141_p9), %v822_v3  ;;  %v826_v12 = vpack.c.bf16 (!%p141_p9), %v193_v10, %v186_v9  ;;  %v192_v15 = vld [vmem:[%s1971_s1 + $0xa8] sm:$0xff] (!%p141_p9)  ;;  %v195_v19 = vld [vmem:[%s1971_s1 + $0xc0] sm:$0xff] (!%p141_p9) }
  0x11   : > { %v185_v14 = vld [vmem:[%s1971_s1 + $0x70] sm:$0xff] (!%p141_p9)  ;;  %825 = vmatpush1.bf16.msra.mxu0 (!%p141_p9), %v824_v7  ;;  %887 = vmatprep.subr.bf16.mxu1 (!%p141_p9), %v886_v8  ;;  %v888_v16 = vpack.c.bf16 (!%p141_p9), %v180_v13, %v173_v11  ;;  %v188_v18 = vld [vmem:[%s1971_s1 + $0x88] sm:$0xff] (!%p141_p9)  ;;  %v207_v22 = vld [vmem:[%s1971_s1 + $0x120] sm:$0xff] (!%p141_p9) }
  0x12   : > { %v828_v17 = vpack.c.bf16 (!%p141_p9), %v192_v15, %v185_v14  ;;  %v200_v20 = vld [vmem:[%s1971_s1 + $0xe8] sm:$0xff] (!%p141_p9)  ;;  %827 = vmatprep.subr.bf16.mxu0 (!%p141_p9), %v826_v12  ;;  %v890_v21 = vpack.c.bf16 (!%p141_p9), %v195_v19, %v188_v18  ;;  %v187_v23 = vld [vmem:[%s1971_s1 + $0x80] sm:$0xff] (!%p141_p9)  ;;  %v194_v24 = vld [vmem:[%s1971_s1 + $0xb8] sm:$0xff] (!%p141_p9) }
  0x13   : > { %889 = vmatpush1.bf16.msra.mxu1 (!%p141_p9), %v888_v16  ;;  %v830_v25 = vpack.c.bf16 (!%p141_p9), %v207_v22, %v200_v20  ;;  %v892_v26 = vpack.c.bf16 (!%p141_p9), %v194_v24, %v187_v23  ;;  %v199_v27 = vld [vmem:[%s1971_s1 + $0xe0] sm:$0xff] (!%p141_p9)  ;;  %v206_v28 = vld [vmem:[%s1971_s1 + $0x118] sm:$0xff] (!%p141_p9)  ;;  %v209_v30 = vld [vmem:[%s1971_s1 + $0x130] sm:$0xff] (!%p141_p9) }
  0x14   : > { %v202_v29 = vld [vmem:[%s1971_s1 + $0xf8] sm:$0xff] (!%p141_p9)  ;;  %891 = vmatprep.subr.bf16.mxu1 (!%p141_p9), %v890_v21  ;;  %v221_v32 = vld [vmem:[%s1971_s1 + $0x190] sm:$0xff] (!%p141_p9)  ;;  %v832_v33 = vpack.c.bf16 (!%p141_p9), %v206_v28, %v199_v27  ;;  %v208_v36 = vld [vmem:[%s1971_s1 + $0x128] sm:$0xff] (!%p141_p9) }
  0x15   : > { %v214_v31 = vld [vmem:[%s1971_s1 + $0x158] sm:$0xff]  ;;  %829 = vmatpush1.bf16.msra.mxu0 %v828_v17  ;;  %v894_v34 = vpack.c.bf16 %v209_v30, %v202_v29  ;;  %v201_v35 = vld [vmem:[%s1971_s1 + $0xf0] sm:$0xff]  ;;  %v220_v39 = vld [vmem:[%s1971_s1 + $0x188] sm:$0xff]  ;;  %s1448_s28 = scalar_select %p164_p10, %s1195_s16, 1 }
  0x16   : > { %v213_v37 = vld [vmem:[%s1971_s1 + $0x150] sm:$0xff]  ;;  %831 = vmatprep.subr.bf16.mxu0 %v830_v25  ;;  %v834_v38 = vpack.c.bf16 %v221_v32, %v214_v31  ;;  %v216_v40 = vld [vmem:[%s1971_s1 + $0x168] sm:$0xff]  ;;  %v223_v41 = vld [vmem:[%s1971_s1 + $0x1a0] sm:$0xff]  ;;  %v896_v42 = vpack.c.bf16 %v208_v36, %v201_v35  ;;  %s1153_s16 = smov [#allocation2]  }
  0x17   : > { %893 = vmatpush1.bf16.msra.mxu1 %v892_v26  ;;  %v228_v43 = vld [vmem:[%s1971_s1 + $0x1c8] sm:$0xff]  ;;  %v235_v44 = vld [vmem:[%s1971_s1 + $0x200] sm:$0xff]  ;;  %v898_v45 = vpack.c.bf16 %v223_v41, %v216_v40  ;;  %v222_v47 = vld [vmem:[%s1971_s1 + $0x198] sm:$0xff]  ;;  %v836_v48 = vpack.c.bf16 %v220_v39, %v213_v37  ;;  %s786_s27 = sshll.u32 %s1448_s28, 4  ;;  %s778_s28 = sshll.u32 %s161_s9, 3 }
  0x18   : > { %895 = vmatprep.subr.bf16.mxu1 %v894_v34  ;;  %v215_v46 = vld [vmem:[%s1971_s1 + $0x160] sm:$0xff]  ;;  %v230_v49 = vld [vmem:[%s1971_s1 + $0x1d8] sm:$0xff]  ;;  %v237_v50 = vld [vmem:[%s1971_s1 + $0x210] sm:$0xff]  ;;  %v838_v51 = vpack.c.bf16 %v235_v44, %v228_v43  ;;  %s1496_s24 = scalar_lea.vmem %s1970_s0, %s786_s27  ;;  %s1152_s27 = smov 64  }
  0x19   : > { %833 = vmatpush1.bf16.msra.mxu0 %v832_v33  ;;  %v227_v52 = vld [vmem:[%s1971_s1 + $0x1c0] sm:$0xff]  ;;  %v234_v53 = vld [vmem:[%s1971_s1 + $0x1f8] sm:$0xff]  ;;  %v900_v54 = vpack.c.bf16 %v222_v47, %v215_v46  ;;  %v249_v56 = vld [vmem:[%s1971_s1 + $0x270] sm:$0xff]  ;;  %v902_v57 = vpack.c.bf16 %v237_v50, %v230_v49  ;;  %s163_s11 = scalar_lea.vmem [#allocation2], %s778_s28  ;;  %s1092_s30 = sshll.u32 %s1153_s16, 4  ;;  %s1093_s30 = int_to_ptr.vmem [resolvable:$false] %s1092_s30 }
  0x1a   : > { %835 = vmatprep.subr.bf16.mxu0 %v834_v38  ;;  %v242_v55 = vld [vmem:[%s1971_s1 + $0x238] sm:$0xff]  ;;  %v229_v58 = vld [vmem:[%s1971_s1 + $0x1d0] sm:$0xff]  ;;  %v236_v59 = vld [vmem:[%s1971_s1 + $0x208] sm:$0xff]  ;;  %v840_v60 = vpack.c.bf16 %v234_v53, %v227_v52  ;;  %s715_s17 = sshll.u32 %s163_s11, 4  ;;  %s1094_s4 = scalar_lea.vmem %s1093_s30, 256  ;;  %s1930_s17 = int_to_ptr.vmem [resolvable:$true] %s715_s17 }
  0x1b   : > { %897 = vmatpush1.bf16.msra.mxu1 %v896_v42  ;;  %v244_v61 = vld [vmem:[%s1971_s1 + $0x248] sm:$0xff]  ;;  %v251_v62 = vld [vmem:[%s1971_s1 + $0x280] sm:$0xff]  ;;  %v842_v63 = vpack.c.bf16 %v249_v56, %v242_v55  ;;  %v241_v0 = vld [vmem:[%s1971_s1 + $0x230] sm:$0xff]  ;;  %v904_v2 = vpack.c.bf16 %v236_v59, %v229_v58  ;;  %s1088_s29 = scalar_lea.vmem %s1930_s17, 128  ;;  %p1095_p0 = scmp.lt.s32.totalorder %s1930_s17, %s1093_s30 }
  0x1c   : > { %899 = vmatprep.subr.bf16.mxu1 %v898_v45  ;;  %v248_v1 = vld [vmem:[%s1971_s1 + $0x268] sm:$0xff]  ;;  %v263_v4 = vld [vmem:[%s1971_s1 + $0x2e0] sm:$0xff]  ;;  %v906_v5 = vpack.c.bf16 %v251_v62, %v244_v61  ;;  %v250_v7 = vld [vmem:[%s1971_s1 + $0x278] sm:$0xff]  ;;  %p1089_p11 = scmp.ne.s32.totalorder %s1930_s17, %s1088_s29  ;;  %p1096_p1 = scmp.lt.s32.totalorder %s1094_s4, %s1088_s29 }
  0x1d   : > { %837 = vmatpush1.bf16.msra.mxu0 %v836_v48  ;;  %v256_v3 = vld [vmem:[%s1971_s1 + $0x2a8] sm:$0xff]  ;;  %v243_v6 = vld [vmem:[%s1971_s1 + $0x240] sm:$0xff]  ;;  %v844_v8 = vpack.c.bf16 %v248_v1, %v241_v0  ;;  %v258_v9 = vld [vmem:[%s1971_s1 + $0x2b8] sm:$0xff] }
  0x1e   : > { %839 = vmatprep.subr.bf16.mxu0 %v838_v51  ;;  %v265_v10 = vld [vmem:[%s1971_s1 + $0x2f0] sm:$0xff]  ;;  %v846_v11 = vpack.c.bf16 %v263_v4, %v256_v3  ;;  %v255_v12 = vld [vmem:[%s1971_s1 + $0x2a0] sm:$0xff]  ;;  %v262_v13 = vld [vmem:[%s1971_s1 + $0x2d8] sm:$0xff]  ;;  %v908_v14 = vpack.c.bf16 %v250_v7, %v243_v6  ;;  %p1090_p12 = pnand %p1089_p11, %p1212_p5  ;;  %p1097_p2 = por %p1096_p1, %p1095_p0 }
  0x1f   : > { %901 = vmatpush1.bf16.msra.mxu1 %v900_v54  ;;  %v270_v15 = vld [vmem:[%s1971_s1 + $0x318] sm:$0xff]  ;;  %v277_v16 = vld [vmem:[%s1971_s1 + $0x350] sm:$0xff]  ;;  %v910_v17 = vpack.c.bf16 %v265_v10, %v258_v9  ;;  %v264_v19 = vld [vmem:[%s1971_s1 + $0x2e8] sm:$0xff]  ;;  %v848_v20 = vpack.c.bf16 %v262_v13, %v255_v12 }
  0x20   : > { %903 = vmatprep.subr.bf16.mxu1 %v902_v57  ;;  %v257_v18 = vld [vmem:[%s1971_s1 + $0x2b0] sm:$0xff]  ;;  %v272_v21 = vld [vmem:[%s1971_s1 + $0x328] sm:$0xff]  ;;  %v279_v22 = vld [vmem:[%s1971_s1 + $0x360] sm:$0xff]  ;;  %v850_v23 = vpack.c.bf16 %v277_v16, %v270_v15  ;;  %p1091_p13 = pneg %p1090_p12 }
  0x21   : > { %841 = vmatpush1.bf16.msra.mxu0 %v840_v60  ;;  %v269_v24 = vld [vmem:[%s1971_s1 + $0x310] sm:$0xff]  ;;  %v276_v25 = vld [vmem:[%s1971_s1 + $0x348] sm:$0xff]  ;;  %v912_v26 = vpack.c.bf16 %v264_v19, %v257_v18  ;;  %v291_v28 = vld [vmem:[%s1971_s1 + $0x3c0] sm:$0xff]  ;;  %v914_v29 = vpack.c.bf16 %v279_v22, %v272_v21 }
  0x22   : > { %843 = vmatprep.subr.bf16.mxu0 %v842_v63  ;;  %v284_v27 = vld [vmem:[%s1971_s1 + $0x388] sm:$0xff]  ;;  %v271_v30 = vld [vmem:[%s1971_s1 + $0x320] sm:$0xff]  ;;  %v278_v31 = vld [vmem:[%s1971_s1 + $0x358] sm:$0xff]  ;;  %v852_v32 = vpack.c.bf16 %v276_v25, %v269_v24  ;;  %p1098_p3 = pnand %p1097_p2, %p1091_p13 }
  0x23   : > { %905 = vmatpush1.bf16.msra.mxu1 %v904_v2  ;;  %v286_v33 = vld [vmem:[%s1971_s1 + $0x398] sm:$0xff]  ;;  %v293_v34 = vld [vmem:[%s1971_s1 + $0x3d0] sm:$0xff]  ;;  %v854_v35 = vpack.c.bf16 %v291_v28, %v284_v27  ;;  %v283_v36 = vld [vmem:[%s1971_s1 + $0x380] sm:$0xff]  ;;  %v916_v38 = vpack.c.bf16 %v278_v31, %v271_v30 }
  0x24   : > { %907 = vmatprep.subr.bf16.mxu1 %v906_v5  ;;  %v290_v37 = vld [vmem:[%s1971_s1 + $0x3b8] sm:$0xff]  ;;  %v305_v40 = vld [vmem:[%s1971_s1 + $0x430] sm:$0xff]  ;;  %v918_v41 = vpack.c.bf16 %v293_v34, %v286_v33  ;;  %v292_v43 = vld [vmem:[%s1971_s1 + $0x3c8] sm:$0xff] }
  0x25   : > { %845 = vmatpush1.bf16.msra.mxu0 %v844_v8  ;;  %v298_v39 = vld [vmem:[%s1971_s1 + $0x3f8] sm:$0xff]  ;;  %v285_v42 = vld [vmem:[%s1971_s1 + $0x390] sm:$0xff]  ;;  %v856_v44 = vpack.c.bf16 %v290_v37, %v283_v36  ;;  %v300_v45 = vld [vmem:[%s1971_s1 + $0x408] sm:$0xff] }
  0x26   : > { %847 = vmatprep.subr.bf16.mxu0 %v846_v11  ;;  %v307_v46 = vld [vmem:[%s1971_s1 + $0x440] sm:$0xff]  ;;  %v858_v47 = vpack.c.bf16 %v305_v40, %v298_v39  ;;  %v297_v48 = vld [vmem:[%s1971_s1 + $0x3f0] sm:$0xff]  ;;  %v304_v49 = vld [vmem:[%s1971_s1 + $0x428] sm:$0xff]  ;;  %v920_v50 = vpack.c.bf16 %v292_v43, %v285_v42 }
  0x27   : > { %909 = vmatpush1.bf16.msra.mxu1 %v908_v14  ;;  %v312_v51 = vld [vmem:[%s1971_s1 + $0x468] sm:$0xff]  ;;  %v319_v52 = vld [vmem:[%s1971_s1 + $0x4a0] sm:$0xff]  ;;  %v922_v53 = vpack.c.bf16 %v307_v46, %v300_v45  ;;  %v306_v55 = vld [vmem:[%s1971_s1 + $0x438] sm:$0xff]  ;;  %v860_v56 = vpack.c.bf16 %v304_v49, %v297_v48 }
  0x28   : > { %911 = vmatprep.subr.bf16.mxu1 %v910_v17  ;;  %v299_v54 = vld [vmem:[%s1971_s1 + $0x400] sm:$0xff]  ;;  %v314_v57 = vld [vmem:[%s1971_s1 + $0x478] sm:$0xff]  ;;  %v321_v58 = vld [vmem:[%s1971_s1 + $0x4b0] sm:$0xff]  ;;  %v862_v59 = vpack.c.bf16 %v319_v52, %v312_v51 }
  0x29   : > { %849 = vmatpush1.bf16.msra.mxu0 %v848_v20  ;;  %v311_v60 = vld [vmem:[%s1971_s1 + $0x460] sm:$0xff]  ;;  %v318_v61 = vld [vmem:[%s1971_s1 + $0x498] sm:$0xff]  ;;  %v924_v62 = vpack.c.bf16 %v306_v55, %v299_v54  ;;  %v333_v0 = vld [vmem:[%s1971_s1 + $0x510] sm:$0xff]  ;;  %v926_v1 = vpack.c.bf16 %v321_v58, %v314_v57 }
  0x2a   : > { %851 = vmatprep.subr.bf16.mxu0 %v850_v23  ;;  %v326_v63 = vld [vmem:[%s1971_s1 + $0x4d8] sm:$0xff]  ;;  %v313_v2 = vld [vmem:[%s1971_s1 + $0x470] sm:$0xff]  ;;  %v320_v3 = vld [vmem:[%s1971_s1 + $0x4a8] sm:$0xff]  ;;  %v864_v4 = vpack.c.bf16 %v318_v61, %v311_v60 }
  0x2b   : > { %913 = vmatpush1.bf16.msra.mxu1 %v912_v26  ;;  %v328_v5 = vld [vmem:[%s1971_s1 + $0x4e8] sm:$0xff]  ;;  %v335_v6 = vld [vmem:[%s1971_s1 + $0x520] sm:$0xff]  ;;  %v866_v7 = vpack.c.bf16 %v333_v0, %v326_v63  ;;  %v325_v8 = vld [vmem:[%s1971_s1 + $0x4d0] sm:$0xff]  ;;  %v928_v11 = vpack.c.bf16 %v320_v3, %v313_v2 }
  0x2c   : > { %915 = vmatprep.subr.bf16.mxu1 %v914_v29  ;;  %v332_v9 = vld [vmem:[%s1971_s1 + $0x508] sm:$0xff]  ;;  %v347_v13 = vld [vmem:[%s1971_s1 + $0x580] sm:$0xff]  ;;  %v930_v14 = vpack.c.bf16 %v335_v6, %v328_v5  ;;  %v334_v16 = vld [vmem:[%s1971_s1 + $0x518] sm:$0xff] }
  0x2d   : > { %853 = vmatpush1.bf16.msra.mxu0 %v852_v32  ;;  %v1517_v10 = vld [vmem:[%s1496_s24 + $0x8] sm:$0xff]  ;;  %v327_v15 = vld [vmem:[%s1971_s1 + $0x4e0] sm:$0xff]  ;;  %v868_v17 = vpack.c.bf16 %v332_v9, %v325_v8  ;;  %v342_v18 = vld [vmem:[%s1971_s1 + $0x558] sm:$0xff] }
  0x2e   : > { %855 = vmatprep.subr.bf16.mxu0 %v854_v35  ;;  %v340_v12 = vld [vmem:[%s1971_s1 + $0x548] sm:$0xff]  ;;  %459 = vmatprep.mubr.f32.mxu0 %v1517_v10  ;;  %v349_v19 = vld [vmem:[%s1971_s1 + $0x590] sm:$0xff]  ;;  %v339_v21 = vld [vmem:[%s1971_s1 + $0x540] sm:$0xff]  ;;  %v932_v23 = vpack.c.bf16 %v334_v16, %v327_v15 }
  0x2f   : > { %917 = vmatpush1.bf16.msra.mxu1 %v916_v38  ;;  %530 = vmatprep.mubr.f32.mxu1 %v1517_v10  ;;  %v870_v20 = vpack.c.bf16 %v347_v13, %v340_v12  ;;  %v346_v22 = vld [vmem:[%s1971_s1 + $0x578] sm:$0xff]  ;;  %v361_v25 = vld [vmem:[%s1971_s1 + $0x5f0] sm:$0xff]  ;;  %v934_v26 = vpack.c.bf16 %v349_v19, %v342_v18  ;;  %v348_v28 = vld [vmem:[%s1971_s1 + $0x588] sm:$0xff] }
  0x30   : > { %919 = vmatprep.subr.bf16.mxu1 %v918_v41  ;;  %v354_v24 = vld [vmem:[%s1971_s1 + $0x5b8] sm:$0xff]  ;;  %v341_v27 = vld [vmem:[%s1971_s1 + $0x550] sm:$0xff]  ;;  %v872_v29 = vpack.c.bf16 %v346_v22, %v339_v21  ;;  %v356_v30 = vld [vmem:[%s1971_s1 + $0x5c8] sm:$0xff] }
  0x31   : > { %857 = vmatpush1.bf16.msra.mxu0 %v856_v44  ;;  %v363_v31 = vld [vmem:[%s1971_s1 + $0x600] sm:$0xff]  ;;  %v874_v32 = vpack.c.bf16 %v361_v25, %v354_v24  ;;  %v353_v33 = vld [vmem:[%s1971_s1 + $0x5b0] sm:$0xff]  ;;  %v360_v34 = vld [vmem:[%s1971_s1 + $0x5e8] sm:$0xff]  ;;  %v936_v35 = vpack.c.bf16 %v348_v28, %v341_v27 }
  0x32   : > { %859 = vmatprep.subr.bf16.mxu0 %v858_v47  ;;  %v368_v36 = vld [vmem:[%s1971_s1 + $0x628] sm:$0xff]  ;;  %v375_v37 = vld [vmem:[%s1971_s1 + $0x660] sm:$0xff]  ;;  %v938_v38 = vpack.c.bf16 %v363_v31, %v356_v30  ;;  %v362_v40 = vld [vmem:[%s1971_s1 + $0x5f8] sm:$0xff]  ;;  %v876_v41 = vpack.c.bf16 %v360_v34, %v353_v33 }
  0x33   : > { %921 = vmatpush1.bf16.msra.mxu1 %v920_v50  ;;  %v355_v39 = vld [vmem:[%s1971_s1 + $0x5c0] sm:$0xff]  ;;  %v370_v42 = vld [vmem:[%s1971_s1 + $0x638] sm:$0xff]  ;;  %v377_v43 = vld [vmem:[%s1971_s1 + $0x670] sm:$0xff]  ;;  %v878_v44 = vpack.c.bf16 %v375_v37, %v368_v36 }
  0x34   : > { %923 = vmatprep.subr.bf16.mxu1 %v922_v53  ;;  %v367_v45 = vld [vmem:[%s1971_s1 + $0x620] sm:$0xff]  ;;  %v374_v46 = vld [vmem:[%s1971_s1 + $0x658] sm:$0xff]  ;;  %v940_v47 = vpack.c.bf16 %v362_v40, %v355_v39  ;;  %v389_v49 = vld [vmem:[%s1971_s1 + $0x6d0] sm:$0xff]  ;;  %v942_v50 = vpack.c.bf16 %v377_v43, %v370_v42 }
  0x35   : > { %861 = vmatpush1.bf16.msra.mxu0 %v860_v56  ;;  %v382_v48 = vld [vmem:[%s1971_s1 + $0x698] sm:$0xff]  ;;  %v369_v51 = vld [vmem:[%s1971_s1 + $0x630] sm:$0xff]  ;;  %v376_v52 = vld [vmem:[%s1971_s1 + $0x668] sm:$0xff]  ;;  %v880_v53 = vpack.c.bf16 %v374_v46, %v367_v45 }
  0x36   : > { %863 = vmatprep.subr.bf16.mxu0 %v862_v59  ;;  %v384_v54 = vld [vmem:[%s1971_s1 + $0x6a8] sm:$0xff]  ;;  %v391_v55 = vld [vmem:[%s1971_s1 + $0x6e0] sm:$0xff]  ;;  %v882_v56 = vpack.c.bf16 %v389_v49, %v382_v48  ;;  %v381_v57 = vld [vmem:[%s1971_s1 + $0x690] sm:$0xff]  ;;  %v944_v59 = vpack.c.bf16 %v376_v52, %v369_v51 }
  0x37   : > { %925 = vmatpush1.bf16.msra.mxu1 %v924_v62  ;;  %v388_v58 = vld [vmem:[%s1971_s1 + $0x6c8] sm:$0xff]  ;;  %v183_v61 = vld [vmem:[%s1971_s1 + $0x60] sm:$0xff]  ;;  %v946_v62 = vpack.c.bf16 %v391_v55, %v384_v54  ;;  %v390_v0 = vld [vmem:[%s1971_s1 + $0x6d8] sm:$0xff] }
  0x38   : > { %927 = vmatprep.subr.bf16.mxu1 %v926_v1  ;;  %v176_v60 = vld [vmem:[%s1971_s1 + $0x28] sm:$0xff]  ;;  %v383_v63 = vld [vmem:[%s1971_s1 + $0x6a0] sm:$0xff]  ;;  %v884_v1 = vpack.c.bf16 %v388_v58, %v381_v57  ;;  %v289_v2 = vld [vmem:[%s1971_s1 + $0x3b0] sm:$0xff] }
  0x39   : > { %865 = vmatpush1.bf16.msra.mxu0 %v864_v4  ;;  %v296_v3 = vld [vmem:[%s1971_s1 + $0x3e8] sm:$0xff]  ;;  %v950_v4 = vpack.c.bf16 %v183_v61, %v176_v60  ;;  %v175_v5 = vld [vmem:[%s1971_s1 + $0x20] sm:$0xff]  ;;  %v182_v6 = vld [vmem:[%s1971_s1 + $0x58] sm:$0xff] }
  0x3a   : > { %867 = vmatprep.subr.bf16.mxu0 %v866_v7  ;;  %v948_v7 = vpack.c.bf16 %v390_v0, %v383_v63  ;;  %v190_v8 = vld [vmem:[%s1971_s1 + $0x98] sm:$0xff]  ;;  %v197_v9 = vld [vmem:[%s1971_s1 + $0xd0] sm:$0xff]  ;;  %v184_v13 = vld [vmem:[%s1971_s1 + $0x68] sm:$0xff]  ;;  %v952_v15 = vpack.c.bf16 %v182_v6, %v175_v5 }
  0x3b   : > { %929 = vmatpush1.bf16.msra.mxu1 %v928_v11  ;;  %v1014_v11 = vpack.c.bf16 %v296_v3, %v289_v2  ;;  %v177_v12 = vld [vmem:[%s1971_s1 + $0x30] sm:$0xff]  ;;  %v303_v16 = vld [vmem:[%s1971_s1 + $0x420] sm:$0xff]  ;;  %v954_v18 = vpack.c.bf16 %v197_v9, %v190_v8  ;;  %v204_v21 = vld [vmem:[%s1971_s1 + $0x108] sm:$0xff] }
  0x3c   : > { %931 = vmatprep.subr.bf16.mxu1 %v930_v14  ;;  %v1654_v14 = vld [vmem:[%s1496_s24] sm:$0xff]  ;;  %v189_v19 = vld [vmem:[%s1971_s1 + $0x90] sm:$0xff]  ;;  %v218_v33 = vld [vmem:[%s1971_s1 + $0x178] sm:$0xff] }
  0x3d   : > { %869 = vmatpush1.bf16.msra.mxu0 %v868_v17  ;;  %v310_v17 = vld [vmem:[%s1971_s1 + $0x458] sm:$0xff]  ;;  %v211_v22 = vld [vmem:[%s1971_s1 + $0x140] sm:$0xff]  ;;  %v317_v28 = vld [vmem:[%s1971_s1 + $0x490] sm:$0xff] }
  0x3e   : > { %871 = vmatprep.subr.bf16.mxu0 %v870_v20  ;;  %v196_v20 = vld [vmem:[%s1971_s1 + $0xc8] sm:$0xff]  ;;  %v1018_v24 = vpack.c.bf16 %v310_v17, %v303_v16  ;;  %v191_v25 = vld [vmem:[%s1971_s1 + $0xa0] sm:$0xff]  ;;  %v958_v30 = vpack.c.bf16 %v211_v22, %v204_v21  ;;  %v225_v34 = vld [vmem:[%s1971_s1 + $0x1b0] sm:$0xff] }
  0x3f   : > { %933 = vmatpush1.bf16.msra.mxu1 %v932_v23  ;;  %v1016_v23 = vpack.c.bf16 %v184_v13, %v177_v12  ;;  %v956_v27 = vpack.c.bf16 %v196_v20, %v189_v19  ;;  %v203_v31 = vld [vmem:[%s1971_s1 + $0x100] sm:$0xff]  ;;  %v205_v37 = vld [vmem:[%s1971_s1 + $0x110] sm:$0xff]  ;;  %v224_v43 = vld [vmem:[%s1971_s1 + $0x1a8] sm:$0xff] }
  0x40   : > { %935 = vmatprep.subr.bf16.mxu1 %v934_v26  ;;  %v198_v26 = vld [vmem:[%s1971_s1 + $0xd8] sm:$0xff]  ;;  %v331_v40 = vld [vmem:[%s1971_s1 + $0x500] sm:$0xff]  ;;  %v217_v42 = vld [vmem:[%s1971_s1 + $0x170] sm:$0xff] }
  0x41   : > { %873 = vmatpush1.bf16.msra.mxu0 %v872_v29  ;;  %v324_v29 = vld [vmem:[%s1971_s1 + $0x4c8] sm:$0xff]  ;;  %v239_v45 = vld [vmem:[%s1971_s1 + $0x220] sm:$0xff]  ;;  %v226_v49 = vld [vmem:[%s1971_s1 + $0x1b8] sm:$0xff] }
  0x42   : > { %875 = vmatprep.subr.bf16.mxu0 %v874_v32  ;;  %v210_v32 = vld [vmem:[%s1971_s1 + $0x138] sm:$0xff]  ;;  %v1022_v36 = vpack.c.bf16 %v324_v29, %v317_v28  ;;  %v219_v48 = vld [vmem:[%s1971_s1 + $0x180] sm:$0xff]  ;;  %v345_v51 = vld [vmem:[%s1971_s1 + $0x570] sm:$0xff] }
  0x43   : > { %937 = vmatpush1.bf16.msra.mxu1 %v936_v35  ;;  %v1020_v35 = vpack.c.bf16 %v198_v26, %v191_v25  ;;  %v960_v39 = vpack.c.bf16 %v210_v32, %v203_v31  ;;  %v352_v52 = vld [vmem:[%s1971_s1 + $0x5a8] sm:$0xff]  ;;  %v231_v54 = vld [vmem:[%s1971_s1 + $0x1e0] sm:$0xff]  ;;  %v238_v55 = vld [vmem:[%s1971_s1 + $0x218] sm:$0xff]  ;;  %v1028_v58 = vpack.c.bf16 %v226_v49, %v219_v48 }
  0x44   : > { %939 = vmatprep.subr.bf16.mxu1 %v938_v38  ;;  %v212_v38 = vld [vmem:[%s1971_s1 + $0x148] sm:$0xff]  ;;  %v253_v57 = vld [vmem:[%s1971_s1 + $0x290] sm:$0xff]  ;;  %v359_v63 = vld [vmem:[%s1971_s1 + $0x5e0] sm:$0xff] }
  0x45   : > { %877 = vmatpush1.bf16.msra.mxu0 %v876_v41  ;;  %v962_v41 = vpack.c.bf16 %v225_v34, %v218_v33  ;;  %v1024_v46 = vpack.c.bf16 %v212_v38, %v205_v37  ;;  %v233_v60 = vld [vmem:[%s1971_s1 + $0x1f0] sm:$0xff]  ;;  %v240_v61 = vld [vmem:[%s1971_s1 + $0x228] sm:$0xff]  ;;  %v366_v0 = vld [vmem:[%s1971_s1 + $0x618] sm:$0xff] }
  0x46   : > { %879 = vmatprep.subr.bf16.mxu0 %v878_v44  ;;  %v232_v44 = vld [vmem:[%s1971_s1 + $0x1e8] sm:$0xff]  ;;  %v245_v2 = vld [vmem:[%s1971_s1 + $0x250] sm:$0xff]  ;;  %v267_v5 = vld [vmem:[%s1971_s1 + $0x300] sm:$0xff]  ;;  %v1032_v6 = vpack.c.bf16 %v240_v61, %v233_v60 }
  0x47   : > { %941 = vmatpush1.bf16.msra.mxu1 %v940_v47  ;;  %v252_v3 = vld [vmem:[%s1971_s1 + $0x288] sm:$0xff]  ;;  %v247_v8 = vld [vmem:[%s1971_s1 + $0x260] sm:$0xff]  ;;  %v254_v9 = vld [vmem:[%s1971_s1 + $0x298] sm:$0xff] }
  0x48   : > { %943 = vmatprep.subr.bf16.mxu1 %v942_v50  ;;  %v964_v50 = vpack.c.bf16 %v224_v43, %v217_v42  ;;  %v373_v12 = vld [vmem:[%s1971_s1 + $0x650] sm:$0xff]  ;;  %v380_v13 = vld [vmem:[%s1971_s1 + $0x688] sm:$0xff]  ;;  %v259_v16 = vld [vmem:[%s1971_s1 + $0x2c0] sm:$0xff]  ;;  %v1036_v20 = vpack.c.bf16 %v254_v9, %v247_v8 }
  0x49   : > { %881 = vmatpush1.bf16.msra.mxu0 %v880_v53  ;;  %v966_v53 = vpack.c.bf16 %v239_v45, %v232_v44  ;;  %v266_v17 = vld [vmem:[%s1971_s1 + $0x2f8] sm:$0xff]  ;;  %v281_v19 = vld [vmem:[%s1971_s1 + $0x370] sm:$0xff]  ;;  %v1038_v21 = vpack.c.bf16 %v380_v13, %v373_v12  ;;  %v387_v25 = vld [vmem:[%s1971_s1 + $0x6c0] sm:$0xff] }
  0x4a   : > { %883 = vmatprep.subr.bf16.mxu0 %v882_v56  ;;  %v246_v56 = vld [vmem:[%s1971_s1 + $0x258] sm:$0xff]  ;;  %v261_v22 = vld [vmem:[%s1971_s1 + $0x2d0] sm:$0xff]  ;;  %v280_v29 = vld [vmem:[%s1971_s1 + $0x368] sm:$0xff] }
  0x4b   : > { %945 = vmatpush1.bf16.msra.mxu1 %v944_v59  ;;  %v1030_v59 = vpack.c.bf16 %v352_v52, %v345_v51  ;;  %v394_v26 = vld [vmem:[%s1971_s1 + $0x6f8] sm:$0xff]  ;;  %v273_v28 = vld [vmem:[%s1971_s1 + $0x330] sm:$0xff]  ;;  %v295_v31 = vld [vmem:[%s1971_s1 + $0x3e0] sm:$0xff] }
  0x4c   : > { %947 = vmatprep.subr.bf16.mxu1 %v946_v62  ;;  %v968_v62 = vpack.c.bf16 %v238_v55, %v231_v54  ;;  %v1042_v33 = vpack.c.bf16 %v394_v26, %v387_v25  ;;  %v275_v34 = vld [vmem:[%s1971_s1 + $0x340] sm:$0xff]  ;;  %v301_v44 = vld [vmem:[%s1971_s1 + $0x410] sm:$0xff]  ;;  %v308_v45 = vld [vmem:[%s1971_s1 + $0x448] sm:$0xff] }
  0x4d   : > { %885 = vmatpush1.bf16.msra.mxu0 %v884_v1  ;;  %v970_v1 = vpack.c.bf16 %v253_v57, %v246_v56  ;;  %v287_v38 = vld [vmem:[%s1971_s1 + $0x3a0] sm:$0xff]  ;;  %v988_v48 = vpack.c.bf16 %v308_v45, %v301_v44  ;;  %v322_v51 = vld [vmem:[%s1971_s1 + $0x4b8] sm:$0xff]  ;;  %v329_v56 = vld [vmem:[%s1971_s1 + $0x4f0] sm:$0xff] }
  0x4e   : > { %951 = vmatprep.subr.bf16.mxu0 %v950_v4  ;;  %v260_v4 = vld [vmem:[%s1971_s1 + $0x2c8] sm:$0xff]  ;;  %v330_v52 = vld [vmem:[%s1971_s1 + $0x4f8] sm:$0xff] }
  0x4f   : > { %949 = vmatpush1.bf16.msra.mxu1 %v948_v7  ;;  %v1034_v7 = vpack.c.bf16 %v366_v0, %v359_v63  ;;  %v336_v57 = vld [vmem:[%s1971_s1 + $0x528] sm:$0xff]  ;;  %v350_v63 = vld [vmem:[%s1971_s1 + $0x598] sm:$0xff] }
  0x50   : > { %460 = vmatmul.mubr.f32.vlgmr.msra.gmra.mrb[0].mxu0 %v1654_v14  ;;  %1015 = vmatprep.subr.bf16.mxu1 %v1014_v11  ;;  %v972_v11 = vpack.c.bf16 %v252_v3, %v245_v2  ;;  %v996_v60 = vpack.c.bf16 %v336_v57, %v329_v56  ;;  %v358_v0 = vld [vmem:[%s1971_s1 + $0x5d8] sm:$0xff] }
  0x51   : > { %953 = vmatpush1.bf16.msra.mxu0 %v952_v15  ;;  %601 = vmatprep.mubr.f32.mxu0 %v1517_v10  ;;  %v974_v15 = vpack.c.bf16 %v267_v5, %v260_v4  ;;  %v357_v4 = vld [vmem:[%s1971_s1 + $0x5d0] sm:$0xff]  ;;  %v364_v5 = vld [vmem:[%s1971_s1 + $0x608] sm:$0xff]  ;;  %v378_v12 = vld [vmem:[%s1971_s1 + $0x678] sm:$0xff] }
  0x52   : > { %531 = vmatmul.mubr.f32.vlgmr.msra.gmra.mrb[0].mxu1 %v1654_v14  ;;  %955 = vmatprep.subr.bf16.mxu0 %v954_v18  ;;  %v274_v18 = vld [vmem:[%s1971_s1 + $0x338] sm:$0xff]  ;;  %v1004_v8 = vpack.c.bf16 %v364_v5, %v357_v4 }
  0x53   : > { %1017 = vmatpush3.bf16.msra.mxu1 %v1016_v23  ;;  %672 = vmatprep.mubr.f32.mxu1 %v1517_v10  ;;  %v338_v10 = vld [vmem:[%s1971_s1 + $0x538] sm:$0xff]  ;;  %v268_v23 = vld [vmem:[%s1971_s1 + $0x308] sm:$0xff] }
  0x54   : > { %1019 = vmatprep.subr.bf16.mxu1 %v1018_v24  ;;  %v1026_v47 = vpack.c.bf16 %v338_v10, %v331_v40  ;;  %v976_v24 = vpack.c.bf16 %v266_v17, %v259_v16  ;;  %v1040_v32 = vpack.c.bf16 %v268_v23, %v261_v22  ;;  %v302_v40 = vld [vmem:[%s1971_s1 + $0x418] sm:$0xff]  ;;  %v309_v10 = vld [vmem:[%s1971_s1 + $0x450] sm:$0xff] }
  0x55   : > { %957 = vmatpush1.bf16.msra.mxu0 %v956_v27  ;;  %v978_v27 = vpack.c.bf16 %v281_v19, %v274_v18  ;;  %v986_v43 = vpack.c.bf16 %v309_v10, %v302_v40  ;;  %v386_v13 = vld [vmem:[%s1971_s1 + $0x6b8] sm:$0xff]  ;;  %v385_v18 = vld [vmem:[%s1971_s1 + $0x6b0] sm:$0xff]  ;;  %v392_v19 = vld [vmem:[%s1971_s1 + $0x6e8] sm:$0xff] }
  0x56   : > { %959 = vmatprep.subr.bf16.mxu0 %v958_v30  ;;  %v288_v30 = vld [vmem:[%s1971_s1 + $0x3a8] sm:$0xff] }
  0x57   : > { %1021 = vmatpush3.bf16.msra.mxu1 %v1020_v35  ;;  %v282_v35 = vld [vmem:[%s1971_s1 + $0x378] sm:$0xff]  ;;  %v982_v37 = vpack.c.bf16 %v295_v31, %v288_v30 }
  0x58   : > { %1023 = vmatprep.subr.bf16.mxu1 %v1022_v36  ;;  %v980_v36 = vpack.c.bf16 %v280_v29, %v273_v28 }
  0x59   : > { %961 = vmatpush1.bf16.msra.mxu0 %v960_v39  ;;  %v294_v39 = vld [vmem:[%s1971_s1 + $0x3d8] sm:$0xff] }
  0x5a   : > { %963 = vmatprep.subr.bf16.mxu0 %v962_v41  ;;  %v1044_v41 = vpack.c.bf16 %v282_v35, %v275_v34  ;;  %v984_v42 = vpack.c.bf16 %v294_v39, %v287_v38 }
  0x5b   : > { %1025 = vmatpush3.bf16.msra.mxu1 %v1024_v46  ;;  %v316_v46 = vld [vmem:[%s1971_s1 + $0x488] sm:$0xff] }
  0x5c   : > { %1027 = vmatprep.subr.bf16.mxu1 %v1026_v47  ;;  %v323_v47 = vld [vmem:[%s1971_s1 + $0x4c0] sm:$0xff] }
  0x5d   : > { %965 = vmatpush1.bf16.msra.mxu0 %v964_v50  ;;  %v990_v49 = vpack.c.bf16 %v323_v47, %v316_v46  ;;  %v315_v50 = vld [vmem:[%s1971_s1 + $0x480] sm:$0xff] }
  0x5e   : > { %967 = vmatprep.subr.bf16.mxu0 %v966_v53  ;;  %v337_v53 = vld [vmem:[%s1971_s1 + $0x530] sm:$0xff]  ;;  %v992_v54 = vpack.c.bf16 %v322_v51, %v315_v50 }
  0x5f   : > { %1029 = vmatpush3.bf16.msra.mxu1 %v1028_v58  ;;  %v994_v55 = vpack.c.bf16 %v337_v53, %v330_v52  ;;  %v344_v58 = vld [vmem:[%s1971_s1 + $0x568] sm:$0xff] }
  0x60   : > { %1031 = vmatprep.subr.bf16.mxu1 %v1030_v59  ;;  %v351_v59 = vld [vmem:[%s1971_s1 + $0x5a0] sm:$0xff] }
  0x61   : > { %969 = vmatpush1.bf16.msra.mxu0 %v968_v62  ;;  %v998_v61 = vpack.c.bf16 %v351_v59, %v344_v58  ;;  %v343_v62 = vld [vmem:[%s1971_s1 + $0x560] sm:$0xff] }
  0x62   : > { %971 = vmatprep.subr.bf16.mxu0 %v970_v1  ;;  %v365_v1 = vld [vmem:[%s1971_s1 + $0x610] sm:$0xff]  ;;  %v1000_v2 = vpack.c.bf16 %v350_v63, %v343_v62 }
  0x63   : > { %1033 = vmatpush3.bf16.msra.mxu1 %v1032_v6  ;;  %v1002_v3 = vpack.c.bf16 %v365_v1, %v358_v0  ;;  %v372_v6 = vld [vmem:[%s1971_s1 + $0x648] sm:$0xff] }
  0x64   : > { %1035 = vmatprep.subr.bf16.mxu1 %v1034_v7  ;;  %v379_v7 = vld [vmem:[%s1971_s1 + $0x680] sm:$0xff] }
  0x65   : > { %973 = vmatpush1.bf16.msra.mxu0 %v972_v11  ;;  %v1006_v9 = vpack.c.bf16 %v379_v7, %v372_v6  ;;  %v371_v11 = vld [vmem:[%s1971_s1 + $0x640] sm:$0xff] }
  0x66   : > { %975 = vmatprep.subr.bf16.mxu0 %v974_v15  ;;  %v393_v15 = vld [vmem:[%s1971_s1 + $0x6f0] sm:$0xff]  ;;  %v1008_v16 = vpack.c.bf16 %v378_v12, %v371_v11 }
  0x67   : > { %1037 = vmatpush3.bf16.msra.mxu1 %v1036_v20  ;;  %v1010_v17 = vpack.c.bf16 %v393_v15, %v386_v13  ;;  %v1012_v20 = vpack.c.bf16 %v392_v19, %v385_v18 }
  0x68   : > { %1039 = vmatprep.subr.bf16.mxu1 %v1038_v21 }
  0x69   : > { %977 = vmatpush1.bf16.msra.mxu0 %v976_v24 }
  0x6a   : > { %979 = vmatprep.subr.bf16.mxu0 %v978_v27 }
  0x6b   : > { %1041 = vmatpush3.bf16.msra.mxu1 %v1040_v32 }
  0x6c   : > { %1043 = vmatprep.subr.bf16.mxu1 %v1042_v33 }
  0x6d   : > { %981 = vmatpush1.bf16.msra.mxu0 %v980_v36  ;;  %v781_v36 = vld [vmem:[%s1972_s2] ss:$0 sm:$0xff] }
  0x6e   : > { %983 = vmatprep.subr.bf16.mxu0 %v982_v37 }
  0x6f   : > { %1045 = vmatpush3.bf16.msra.mxu1 %v1044_v41 }
  0x71   : > { %985 = vmatpush1.bf16.msra.mxu0 %v984_v42 }
  0x72   : > { %987 = vmatprep.subr.bf16.mxu0 %v986_v43  ;;  %673 = vmatmul.mubr.f32.vlgmr.msra.gmra.mrb[2].mxu1 %v1654_v14 }
  0x75   : > { %989 = vmatpush1.bf16.msra.mxu0 %v988_v48 }
  0x76   : > { %991 = vmatprep.subr.bf16.mxu0 %v990_v49 }
  0x79   : > { %993 = vmatpush1.bf16.msra.mxu0 %v992_v54 }
  0x7a   : > { %995 = vmatprep.subr.bf16.mxu0 %v994_v55 }
  0x7d   : > { %997 = vmatpush1.bf16.msra.mxu0 %v996_v60 }
  0x7e   : > { %999 = vmatprep.subr.bf16.mxu0 %v998_v61 }
  0x81   : > { %1001 = vmatpush1.bf16.msra.mxu0 %v1000_v2 }
  0x82   : > { %1003 = vmatprep.subr.bf16.mxu0 %v1002_v3 }
  0x85   : > { %1005 = vmatpush1.bf16.msra.mxu0 %v1004_v8 }
  0x86   : > { %1007 = vmatprep.subr.bf16.mxu0 %v1006_v9 }
  0x89   : > { %1009 = vmatpush1.bf16.msra.mxu0 %v1008_v16 }
  0x8a   : > { %1011 = vmatprep.subr.bf16.mxu0 %v1010_v17 }
  0x8d   : > { %1013 = vmatpush1.bf16.msra.mxu0 %v1012_v20 }
  0x90   : > { %602 = vmatmul.mubr.f32.vlgmr.msra.gmra.mrb[2].mxu0 %v1654_v14 }
 0x123   : > { %v461_v21 = vpop.f32.mrb[0].mxu0 }
 0x124   : > { %v463_v22 = vpop.f32.mrb[1].mxu0 }
 0x125   : > { %v678_v23 = vmax.f32 %v461_v21, %v463_v22  ;;  %v532_v24 = vpop.f32.mrb[0].mxu1 }
 0x126   : > { %v534_v25 = vpop.f32.mrb[1].mxu1 }
 0x127   : > { %v679_v26 = vmax.f32 %v678_v23, %v532_v24 }
 0x129   : > { %v680_v27 = vmax.f32 %v679_v26, %v534_v25 }
 0x145   : > { %v819_v28 = vpop.f32.mrb[2].mxu1 }
 0x146   : > { %v820_v29 = vpop.f32.mrb[3].mxu1 }
 0x147   : > { %v821_v30 = vadd.f32 %v820_v29, %v819_v28 }
 0x163   : > { %v603_v31 = vpop.f32.mrb[2].mxu0 }
 0x164   : > { %v681_v32 = vmax.f32 %v680_v27, %v603_v31  ;;  %v605_v33 = vpop.f32.mrb[3].mxu0 }
 0x166   : > { %v682_v34 = vmax.f32 %v681_v32, %v605_v33 }
 0x168   : > { %v683_v35 = vmax.f32 %v682_v34, %v821_v30 }
 0x16a   : > { %685 = vrot.lane.b32.xlu0 %v683_v35, %s1152_s27 }
 0x1dc   : > { %v686_v14 = vpop.permute.xlu0 %685 }
 0x1dd   : > { %v688_v37 = vmax.f32 %v683_v35, %v686_v14 }
 0x1df   : > { %v696_v38 = vadd.f32 %v781_v36, %v688_v37 }
 0x1e1   : > { %1086 = vtanh.f32 %v696_v38 }
 0x1eb   : > { %v1087_v39 = vpop.eup %1086 }
 0x1ec   : > { %v699_v40 = vsel %vm698_vm0, %v1087_v39, 0.0 }
 0x1ed   : > { %700 = vst [vmem:[%s163_s11] sm:$0xff] %v699_v40 }
 0x1ee   : > { %1101 = shalt.err (!%p1098_p3)
}
 0x1ef   : > { %s1102_s5 = scalar_lea.hbm %s1928_s25, 128  ;;  %s1106_s27 = scalar_lea.hbm %s1973_s3, 256 }
 0x1f0   : > { %p1103_p4 = scmp.ne.s32.totalorder %s1928_s25, %s1102_s5  ;;  %p1107_p9 = scmp.lt.u32.totalorder %s1928_s25, %s1973_s3 }
 0x1f1   : > { %p1108_p10 = scmp.lt.u32.totalorder %s1106_s27, %s1102_s5  ;;  %p1110_p12 = scmp.lt.u32.totalorder %s1102_s5, %s1928_s25 }
 0x1f2   : > { %p1104_p7 = pnand %p1103_p4, %p1212_p5 }
 0x1f3   : > { %p1109_p11 = por %p1108_p10, %p1107_p9 }
 0x1f4   : > { %p1105_p8 = pneg %p1104_p7 }
 0x1f5   : > { %p1111_p13 = por %p1110_p12, %p1109_p11 }
 0x1f7   : > { %p1112_p0 = pnand %p1111_p13, %p1105_p8 }
 0x1f9   : > { %1115 = shalt.err (!%p1112_p0)
}
 0x1fa   : > { %1046 = dma.vmem_to_hbm [thread:$0]  (%p1212_p5), %s1930_s17, 128, %s1928_s25, %s702_s26  }
 0x1fb PF: > { %p1052_p1 = scmp.ge.s32.totalorder %s1150_s15, 2  ;;  %s727_s9 = sand.u32 1, %s1138_s12  }
 0x1fc   : > { %s728_s28 = scalar_lea.sflag [#allocation3], %s727_s9 }
 0x1fd   : > { %p1049_p2 = pnand %p1052_p1, %p1216_p6 }
 0x1ff   : > { %1133 = dma.done.wait (!%p1049_p2), %s728_s28, 128  }
 0x200   : > { %1135 = vsyncadd (!%p1049_p2), %s728_s28, 4294967168  ;;  %p13_p3 = scmp.ge.s32.totalorder %s1199_s18, 4   ;;  %s1976_s12 = smov %s1142_s13 }
 0x201   : > { %s1977_s13 = smov %s1146_s14  ;;  %s1978_s14 = smov %s1210_s21 }
 0x202   : > { %s1979_s15 = smov %s1199_s18  ;;  %15 = sbr.rel (!%p13_p3) target bundleno = 3 (0x3), region = 67 }
 0x209   :  { %733 = vsyncpa [#allocation3], 1 }
 0x20a   :  { %735 = vsyncpa [#allocation3 + $0x1], 1 }

</bundles_post_ra>
